<compile_context>
chip_gen: v5e
topology: v5e:2x2
jax: 0.10.0
libtpu: 0.0.40
codegen_flags: <defaults>
</compile_context>

<pallas_src>
import jax
import jax.numpy as jnp
from jax.experimental import pallas as pl
from jax.experimental.pallas import tpu as pltpu

EPS = 1e-12  # TF-style eps, inside the sqrt (matches the PyTorch module)

# Per-grid-step working-set cap (elements). With f32 compute temporaries this
# keeps 2x(in)+2x(out) buffers plus ~4 f32 temps under ~40 MiB, safe for the
# v7x 64 MiB VMEM (and trivially for v5e/v6e 128 MiB).
_MAX_TILE_ELEMS = 1 << 20
_VMEM_LIMIT_BYTES = 48 * 1024 * 1024


def _pe_layernorm_kernel(x_ref, pe_ref, w_ref, b_ref, o_ref):
    # x_ref:  (TB, TS, D) tile of x for (seq-tile si, batch-tile bi)
    # pe_ref: (TS, D)     positional-embedding tile (shared across the batch tile)
    # w_ref:  (1, D)      layernorm gamma
    # b_ref:  (1, D)      layernorm beta
    x = x_ref[...].astype(jnp.float32)            # (TB, TS, D)
    pe = pe_ref[...].astype(jnp.float32)          # (TS, D)
    h = x + pe[None, :, :]                        # broadcast add over batch-tile dim

    mean = jnp.mean(h, axis=-1, keepdims=True)    # (TB, TS, 1)
    d = h - mean                                  # hoisted, reused twice
    var = jnp.mean(d * d, axis=-1, keepdims=True)  # biased variance (two-pass, stable)
    inv = jax.lax.rsqrt(var + EPS)                # EUP path; eps inside the sqrt

    w = w_ref[...].astype(jnp.float32)[None, :, :]    # (1, 1, D)
    b = b_ref[...].astype(jnp.float32)[None, :, :]
    o_ref[...] = (w * (d * inv) + b).astype(o_ref.dtype)


def _pick_seq_tile(seq_len, mult, target=512):
    """Sequence tile TS (multiple of sublane packing where possible) and grid_s.

    Preference order:
      1. largest divisor of seq_len that is a multiple of `mult` and <= target
         (exact tiling, no edge blocks);
      2. largest multiple of `mult` <= min(target, seq_len), with cdiv grid and
         Pallas-masked edge blocks (avoids a full-extent (1, S, D) fallback that
         could blow VMEM for large/odd S);
      3. seq_len itself (only when seq_len < mult, i.e. a tiny sequence).
    """
    hi = min(target, seq_len)
    for cand in range(hi, 0, -1):
        if cand % mult == 0 and seq_len % cand == 0:
            return cand, seq_len // cand
    if seq_len >= mult:
        ts = (hi // mult) * mult
        return ts, pl.cdiv(seq_len, ts)
    return seq_len, 1


def _pick_batch_tile(batch, ts, d, grid_s):
    """Batch tile TB under the per-step element budget (prefer divisors of B)."""
    cap = max(1, _MAX_TILE_ELEMS // max(1, ts * d))
    tb = 1
    for cand in range(min(batch, 8, cap), 0, -1):
        if batch % cand == 0:
            tb = cand
            break
    # v7x megacore: if the seq axis has only one step, make sure the batch axis
    # has >= 2 so the "parallel" split actually feeds both TensorCores.
    if grid_s == 1 and batch >= 2 and pl.cdiv(batch, tb) < 2:
        tb = max(1, tb // 2)
    return tb, pl.cdiv(batch, tb)


def positional_encoding_forward(x, pos_emb_table, ln_weight, ln_bias):
    """x: (B, S, D); pos_emb_table: (max_len, D); ln_weight/ln_bias: (D,)."""
    B, S, D = x.shape
    dtype = x.dtype
    mult = 16 if dtype == jnp.bfloat16 else 8

    # Stream parameters in the I/O dtype (halves pe DMA bytes for bf16 inputs);
    # compute is upcast to f32 inside the kernel.
    table = pos_emb_table.astype(dtype)
    w2d = ln_weight.astype(dtype).reshape(1, D)
    b2d = ln_bias.astype(dtype).reshape(1, D)

    TS, grid_s = _pick_seq_tile(S, mult)
    TB, grid_b = _pick_batch_tile(B, TS, D, grid_s)

    needed_rows = grid_s * TS
    if grid_s == 1 and TS == S:
        # Tiny / awkward S: use a full-extent pe block (always a legal shape).
        pe = table[:S, :]
    elif needed_rows <= table.shape[0]:
        # Common case: hand the embedding table to pallas_call directly; the
        # BlockSpec only ever touches rows < needed_rows <= max_len.
        pe = table
    else:
        # Edge blocks would run past max_len; pad once in the wrapper.
        pe = jnp.pad(table[:S, :], ((0, needed_rows - S), (0, 0)))

    # NOTE: real model dims should keep D a multiple of 128 for lane-dense
    # (unmasked) stores; D is the reduction axis, so padding it here would
    # require masked mean/var and is left to the caller / model layout.
    out = pl.pallas_call(
        _pe_layernorm_kernel,
        out_shape=jax.ShapeDtypeStruct((B, S, D), dtype),
        grid_spec=pltpu.PrefetchScalarGridSpec(
            num_scalar_prefetch=0,
            # seq-tile axis OUTER so the pe tile stays resident across batch tiles.
            grid=(grid_s, grid_b),
            in_specs=[
                pl.BlockSpec((TB, TS, D), lambda si, bi: (bi, si, 0)),  # x tile
                pl.BlockSpec((TS, D), lambda si, bi: (si, 0)),          # positional embeddings
                pl.BlockSpec((1, D), lambda si, bi: (0, 0)),            # gamma
                pl.BlockSpec((1, D), lambda si, bi: (0, 0)),            # beta
            ],
            out_specs=pl.BlockSpec((TB, TS, D), lambda si, bi: (bi, si, 0)),
        ),
        compiler_params=pltpu.CompilerParams(
            dimension_semantics=("parallel", "parallel"),
            vmem_limit_bytes=_VMEM_LIMIT_BYTES,
        ),
    )(x, pe, w2d, b2d)
    # TODO(synk): nn.Dropout omitted (eval-mode identity); add PRNG-masked dropout
    # (pltpu.prng_seed / prng_random_bits) if training semantics are needed.
    return out


if __name__ == "__main__":
    B, S, D = 2, 8, 32
    MAX_LEN = 64  # stand-in for max_len=5000 at small scale

    key = jax.random.PRNGKey(0)
    kx, kemb = jax.random.split(key)

    x = jax.random.normal(kx, (B, S, D), dtype=jnp.float32)
    # deterministic parameter init (nn.Embedding default ~ N(0,1); LayerNorm gamma=1, beta=0)
    pos_emb_table = jax.random.normal(kemb, (MAX_LEN, D), dtype=jnp.float32)
    ln_weight = jnp.ones((D,), dtype=jnp.float32)
    ln_bias = jnp.zeros((D,), dtype=jnp.float32)

    out = positional_encoding_forward(x, pos_emb_table, ln_weight, ln_bias)
    out = jax.block_until_ready(out)

    # sanity check against pure-JAX reference
    h = x + pos_emb_table[:S][None, :, :]
    mean = h.mean(-1, keepdims=True)
    var = ((h - mean) ** 2).mean(-1, keepdims=True)
    ref = ln_weight * ((h - mean) / jnp.sqrt(var + EPS)) + ln_bias
    assert jnp.allclose(out, ref, atol=1e-5, rtol=1e-5), "mismatch vs reference"

    print("KERNEL_OK")
</pallas_src>

<mosaic_0001>
module attributes {stable_mosaic.version = 11 : i64} {
  func.func @_pe_layernorm_kernel(%arg0: i32, %arg1: i32, %arg2: memref<1x8x32xf32, #tpu.memory_space<vmem>>, %arg3: memref<8x32xf32, #tpu.memory_space<vmem>>, %arg4: memref<1x32xf32, #tpu.memory_space<vmem>>, %arg5: memref<1x32xf32, #tpu.memory_space<vmem>>, %arg6: memref<1x8x32xf32, #tpu.memory_space<vmem>>) attributes {dimension_semantics = [#tpu.dimension_semantics<parallel>, #tpu.dimension_semantics<parallel>], iteration_bounds = array<i64: 1, 2>, scalar_prefetch = 0 : i64, scratch_operands = 0 : i64, tpu.core_type = #tpu.core_type<tc>, window_params = [{transform_indices = @transform_0, window_bounds = array<i64: 1, 8, 32>}, {transform_indices = @transform_1, window_bounds = array<i64: 8, 32>}, {pipeline_mode = #tpu.pipeline_mode<synchronous>, transform_indices = @transform_2, window_bounds = array<i64: 1, 32>}, {pipeline_mode = #tpu.pipeline_mode<synchronous>, transform_indices = @transform_3, window_bounds = array<i64: 1, 32>}, {transform_indices = @transform_4, window_bounds = array<i64: 1, 8, 32>}]} {
    %c0 = arith.constant 0 : index
    %c0_0 = arith.constant 0 : index
    %c0_1 = arith.constant 0 : index
    %0 = vector.load %arg2[%c0, %c0_0, %c0_1] : memref<1x8x32xf32, #tpu.memory_space<vmem>>, vector<1x8x32xf32>
    %c0_2 = arith.constant 0 : index
    %c0_3 = arith.constant 0 : index
    %1 = vector.load %arg3[%c0_2, %c0_3] : memref<8x32xf32, #tpu.memory_space<vmem>>, vector<8x32xf32>
    %2 = vector.shape_cast %1 : vector<8x32xf32> to vector<1x8x32xf32>
    %3 = arith.addf %0, %2 : vector<1x8x32xf32>
    %cst = arith.constant dense<0.000000e+00> : vector<1x8xf32>
    %4 = vector.multi_reduction <add>, %3, %cst [2] : vector<1x8x32xf32> to vector<1x8xf32>
    %5 = vector.shape_cast %4 : vector<1x8xf32> to vector<1x8x1xf32>
    %cst_4 = arith.constant 3.200000e+01 : f32
    %6 = vector.broadcast %cst_4 : f32 to vector<1x8x1xf32>
    %7 = arith.divf %5, %6 : vector<1x8x1xf32>
    %8 = vector.broadcast %7 : vector<1x8x1xf32> to vector<1x8x32xf32>
    %9 = arith.subf %3, %8 : vector<1x8x32xf32>
    %10 = arith.mulf %9, %9 : vector<1x8x32xf32>
    %cst_5 = arith.constant dense<0.000000e+00> : vector<1x8xf32>
    %11 = vector.multi_reduction <add>, %10, %cst_5 [2] : vector<1x8x32xf32> to vector<1x8xf32>
    %12 = vector.shape_cast %11 : vector<1x8xf32> to vector<1x8x1xf32>
    %cst_6 = arith.constant 3.200000e+01 : f32
    %13 = vector.broadcast %cst_6 : f32 to vector<1x8x1xf32>
    %14 = arith.divf %12, %13 : vector<1x8x1xf32>
    %cst_7 = arith.constant 9.99999996E-13 : f32
    %15 = vector.broadcast %cst_7 : f32 to vector<1x8x1xf32>
    %16 = arith.addf %14, %15 : vector<1x8x1xf32>
    %17 = math.rsqrt %16 : vector<1x8x1xf32>
    %c0_8 = arith.constant 0 : index
    %c0_9 = arith.constant 0 : index
    %18 = vector.load %arg4[%c0_8, %c0_9] : memref<1x32xf32, #tpu.memory_space<vmem>>, vector<1x32xf32>
    %19 = vector.shape_cast %18 : vector<1x32xf32> to vector<1x1x32xf32>
    %c0_10 = arith.constant 0 : index
    %c0_11 = arith.constant 0 : index
    %20 = vector.load %arg5[%c0_10, %c0_11] : memref<1x32xf32, #tpu.memory_space<vmem>>, vector<1x32xf32>
    %21 = vector.shape_cast %20 : vector<1x32xf32> to vector<1x1x32xf32>
    %22 = vector.broadcast %17 : vector<1x8x1xf32> to vector<1x8x32xf32>
    %23 = arith.mulf %9, %22 : vector<1x8x32xf32>
    %24 = vector.broadcast %19 : vector<1x1x32xf32> to vector<1x8x32xf32>
    %25 = arith.mulf %24, %23 : vector<1x8x32xf32>
    %26 = vector.broadcast %21 : vector<1x1x32xf32> to vector<1x8x32xf32>
    %27 = arith.addf %25, %26 : vector<1x8x32xf32>
    %c0_12 = arith.constant 0 : index
    %c0_13 = arith.constant 0 : index
    %c0_14 = arith.constant 0 : index
    %28 = vector.load %arg6[%c0_12, %c0_13, %c0_14] : memref<1x8x32xf32, #tpu.memory_space<vmem>>, vector<1x8x32xf32>
    tpu.vector_store %arg6[%c0_12, %c0_13, %c0_14], %27 {strides = array<i32>} : memref<1x8x32xf32, #tpu.memory_space<vmem>>, vector<1x8x32xf32>,
    return
  }
  func.func @transform_0(%arg0: i32, %arg1: i32) -> (i32, i32, i32) {
    %c0_i32 = arith.constant 0 : i32
    %c0_i32_0 = arith.constant 0 : i32
    return %arg1, %arg0, %c0_i32 : i32, i32, i32
  }
  func.func @transform_1(%arg0: i32, %arg1: i32) -> (i32, i32) {
    %c0_i32 = arith.constant 0 : i32
    %c0_i32_0 = arith.constant 0 : i32
    return %arg0, %c0_i32 : i32, i32
  }
  func.func @transform_2(%arg0: i32, %arg1: i32) -> (i32, i32) {
    %c0_i32 = arith.constant 0 : i32
    %c0_i32_0 = arith.constant 0 : i32
    %c0_i32_1 = arith.constant 0 : i32
    return %c0_i32, %c0_i32_0 : i32, i32
  }
  func.func @transform_3(%arg0: i32, %arg1: i32) -> (i32, i32) {
    %c0_i32 = arith.constant 0 : i32
    %c0_i32_0 = arith.constant 0 : i32
    %c0_i32_1 = arith.constant 0 : i32
    return %c0_i32, %c0_i32_0 : i32, i32
  }
  func.func @transform_4(%arg0: i32, %arg1: i32) -> (i32, i32, i32) {
    %c0_i32 = arith.constant 0 : i32
    %c0_i32_0 = arith.constant 0 : i32
    return %arg1, %arg0, %c0_i32 : i32, i32, i32
  }
}

</mosaic_0001>

<bundles_post_ra>
// kernel: tpu_custom_call.1
= control target key start
LH: loop header
LB: loop body
LE: loop exit
PB: predicated region body
PF: predicated region fallthrough
CT: control target
= control target key end

     0   :  { %9 = vsyncpa [#allocation3], 0  ;;  %s839_s0 = inlined_call_operand.hbm [shape: f32[2,8,32], index: 0, kind: input, shape index: {}]   ;;  %s840_s1 = inlined_call_operand.hbm [shape: f32[8,32], index: 1, kind: input, shape index: {}]   ;;  %s841_s2 = inlined_call_operand.vmem [shape: f32[1,32], index: 2, kind: input, shape index: {}]   ;;  %s842_s3 = inlined_call_operand.vmem [shape: f32[1,32], index: 3, kind: input, shape index: {}]   ;;  %s843_s4 = inlined_call_operand.hbm [shape: f32[2,8,32], index: 4, kind: output, shape index: {}]  }
   0x1   :  { %11 = vsyncpa [#allocation3 + $0x1], 0 }
   0x2   :  { %12 = vsyncpa [#allocation6], 0 }
   0x3   :  { %13 = vsyncpa [#allocation4], 0 }
   0x4   :  { %15 = vsyncpa [#allocation4 + $0x1], 0  ;;  %s677_s15 = smov 0   ;;  %s679_s16 = smov 0  }
   0x5   :  { %s681_s17 = smov 0   ;;  %s683_s18 = smov 0  }
   0x6   :  { %s685_s19 = smov 0   ;;  %s687_s20 = smov 0  }
   0x7 LB: > { %s407_s21 = sadd.s32 4294967295, %s648_s20   ;;  %s408_s22 = sadd.s32 4294967294, %s648_s20   ;;  %s648_s20 = sphi %s687_s20, %s21_s20   ;;  %s644_s19 = sphi %s685_s19, %s855_s19   ;;  %s640_s18 = sphi %s683_s18, %s854_s18   ;;  %s636_s17 = sphi %s681_s17, %s853_s17   ;;  %s632_s16 = sphi %s679_s16, %s852_s16   ;;  %s628_s15 = sphi %s677_s15, %s851_s15  }
   0x8   : > { %p55_p0 = scmp.ne.s32.totalorder %s632_s16, %s628_s15  ;;  %p711_p1 = scmp.eq.s32.totalorder %s407_s21, 0 }
   0x9   : > { %p715_p2 = scmp.eq.s32.totalorder %s407_s21, 1  ;;  %p155_p3 = scmp.eq.s32.totalorder %s408_s22, 1 }
   0xa   : > { %p721_p4 = por %p711_p1, %p55_p0  ;;  %p409_p5 = scmp.ge.s32.totalorder %s648_s20, 1 }
   0xb   : > { %p726_p6 = por %p155_p3, %p55_p0  ;;  %p162_p7 = scmp.lt.s32.totalorder %s648_s20, 3 }
   0xc   : > { %s176_s29 = sshll.u32 %s840_s1, 4  ;;  %p411_p9 = scmp.ge.s32.totalorder %s648_s20, 2  ;;  %s177_s29 = int_to_ptr.hbm [resolvable:$true] %s176_s29 }
   0xd   : > { %p734_p8 = pnand %p409_p5, %p162_p7  ;;  %s650_s5 = smov [#allocation5]  }
   0xe   : > { %s178_s6 = sshll.u32 %s650_s5, 4  ;;  %s30_s7 = sadd.s32 1, %s644_s19  ;;  %s179_s6 = int_to_ptr.vmem [resolvable:$true] %s178_s6 }
   0xf   : > { %p430_p10 = pneg %p734_p8  ;;  %p31_p12 = scmp.ge.s32.totalorder %s30_s7, 2 }
  0x10   : > { %s42_s8 = sadd.s32 1, %s636_s17  ;;  %p49_p13 = scmp.ne.s32.totalorder %s636_s17, %s632_s16 }
  0x11   : > { %p431_p11 = pnand %p430_p10, %p711_p1  ;;  %p50_p0 = scmp.eq.s32.totalorder %s648_s20, 0 }
  0x12   : > { %s857_s7 = smov (%p31_p12, %s30_s7), 0  ;;  %p756_p5 = por %p715_p2, %p49_p13 }
  0x13   : > { %433 = dma.hbm_to_vmem [thread:$0]  (!%p431_p11), %s177_s29, 128, %s179_s6, [#allocation6]  }
  0x14   : > { %p750_p3 = por %p50_p0, %p49_p13  ;;  %s37_s11 = ssub.s32 %s644_s19, %s857_s7 }
  0x15   : > { %p443_p7 = scmp.lt.s32.totalorder %s648_s20, 2  ;;  %p40_p10 = scmp.eq.s32.totalorder %s37_s11, 0 }
  0x16   : > { %s195_s12 = sand.u32 1, %s636_s17   ;;  %s413_s21 = sshll.u32 %s644_s19, 3 }
  0x17   : > { %s412_s13 = sshll.u32 %s195_s12, 3  ;;  %s204_s28 = scalar_lea.hbm %s839_s0, %s413_s21 }
  0x18   : > { %s765_s14 = scalar_select %p40_p10, %s636_s17, %s42_s8  }
  0x19   : > { %s199_s29 = scalar_lea.vmem [#allocation2], %s412_s13  ;;  %s206_s24 = sshll.u32 %s204_s28, 4  ;;  %s207_s24 = int_to_ptr.hbm [resolvable:$true] %s206_s24 }
  0x1a   : > { %s208_s5 = sshll.u32 %s199_s29, 4  ;;  %p435_p2 = pnand %p443_p7, %p750_p3  ;;  %s209_s5 = int_to_ptr.vmem [resolvable:$true] %s208_s5 }
  0x1b   : > { %s196_s6 = scalar_lea.sflag [#allocation3], %s195_s12  ;;  %217 = sbr.rel (%p734_p8) target bundleno = 309 (0x135), region = 36 }
  0x1c   : > { %437 = dma.hbm_to_vmem [thread:$0]  (!%p435_p2), %s207_s24, 128, %s209_s5, %s196_s6  }
  0x1d   : > { %s776_s8 = sand.u32 (!%p734_p8), 1, %s632_s16  }
  0x1e   : > { %s415_s11 = sshll.u32 (!%p734_p8), %s776_s8, 3  ;;  %s220_s13 = scalar_lea.sflag (!%p734_p8), [#allocation3], %s776_s8 }
  0x1f   : > { %s223_s21 = scalar_lea.vmem (!%p734_p8), [#allocation2], %s415_s11 }
  0x20   : > { %615 = dma.done.wait (%p721_p4), %s220_s13, 128  }
  0x21   : > { %617 = vsyncadd (%p721_p4), %s220_s13, 4294967168 }
  0x22   : > { %619 = dma.done.wait (%p711_p1), [#allocation6], 128  }
  0x23   : > { %621 = vsyncadd (%p711_p1), [#allocation6], 4294967168  ;;  %v254_v0 = vld [vmem:[%s223_s21] sm:$0xff]  ;;  %v255_v1 = vld [vmem:[#allocation5] sm:$0xff]  ;;  %vm257_vm0 = vcmask 261120   ;;  %v651_v4 = vmov 32.0  }
  0x24   : > { %v256_v2 = vadd.f32 %v255_v1, %v254_v0  ;;  %498 = vrcp.f32 %v651_v4  ;;  %s419_s23 = sshll.u32 %s640_s18, 3  ;;  %v496_v25 = vld [vmem:[%s841_s2] ss:$0 sm:$0xff]  ;;  %s253_s18 = scalar_lea.vmem [#allocation7], %s415_s11 }
  0x25   : > { %s310_s22 = scalar_lea.hbm %s843_s4, %s419_s23  ;;  %v497_v28 = vld [vmem:[%s842_s3] ss:$0 sm:$0xff]  ;;  %s312_s29 = sshll.u32 %s253_s18, 4  ;;  %s313_s29 = int_to_ptr.vmem [resolvable:$true] %s312_s29 }
  0x26   : > { %v258_v3 = vsel %vm257_vm0, %v256_v2, 0.0  ;;  %s314_s5 = sshll.u32 %s310_s22, 4  ;;  %s299_s24 = scalar_lea.sflag [#allocation4], %s776_s8  ;;  %s315_s5 = int_to_ptr.hbm [resolvable:$true] %s314_s5 }
  0x27   : > { %259 = vadd.xlane.f32.xlu0 %v258_v3  ;;  %s576_s6 = sshra.s32 %s315_s5, 4  ;;  %s582_s11 = scalar_lea.hbm %s843_s4, 16  ;;  %s577_s6 = int_to_ptr.hbm [resolvable:$true] %s576_s6 }
  0x28   : > { %s578_s13 = scalar_lea.hbm %s577_s6, 8  ;;  %p583_p11 = scmp.lt.s32.totalorder %s577_s6, %s843_s4 }
  0x29   : > { %p579_p1 = scmp.ne.s32.totalorder %s577_s6, %s578_s13  ;;  %p584_p12 = scmp.lt.s32.totalorder %s582_s11, %s578_s13 }
  0x2a   : > { %v499_v5 = vpop.eup %498 }
  0x2b   : > { %v262_v6 = vmul.f32 32.0, %v499_v5  ;;  %vm266_vm1 = vweird.f32 %v499_v5  ;;  %p580_p4 = pnand %p579_p1, %p756_p5  ;;  %p585_p13 = por %p584_p12, %p583_p11 }
  0x2d   : > { %v263_v7 = vsub.f32 1.0, %v262_v6  ;;  %p581_p8 = pneg %p580_p4 }
  0x2f   : > { %v264_v8 = vmul.f32 %v499_v5, %v263_v7  ;;  %p586_p0 = pnand %p585_p13, %p581_p8 }
  0x31   : > { %v265_v9 = vadd.f32 %v499_v5, %v264_v8 }
  0x33   : > { %v267_v10 = vsel %vm266_vm1, %v499_v5, %v265_v9 }
  0x9a   : > { %v260_v11 = vpop.xlane.xlu0 %259 }
  0x9b   : > { %v268_v12 = vmul.f32 %v267_v10, %v260_v11 }
  0x9d   : > { %v269_v13 = vsub.f32 %v256_v2, %v268_v12 }
  0x9f   : > { %v270_v14 = vmul.f32 %v269_v13, %v269_v13 }
  0xa1   : > { %v271_v15 = vsel %vm257_vm0, %v270_v14, 0.0 }
  0xa2   : > { %272 = vadd.xlane.f32.xlu0 %v271_v15 }
 0x115   : > { %v273_v16 = vpop.xlane.xlu0 %272 }
 0x116   : > { %v274_v17 = vmul.f32 %v273_v16, %v267_v10 }
 0x118   : > { %v275_v18 = vadd.f32 1e-12, %v274_v17 }
 0x11a   : > { %500 = vrsqrt.f32 %v275_v18  ;;  %vm282_vm3 = vweird.f32 %v275_v18 }
 0x120   : > { %v501_v19 = vpop.eup %500 }
 0x121   : > { %v277_v20 = vmul.f32 %v501_v19, %v275_v18  ;;  %vm283_vm2 = vweird.f32 %v501_v19 }
 0x122   : > { %vm284_vm4 = vmor %vm282_vm3, %vm283_vm2 }
 0x123   : > { %v278_v21 = vmul.f32 %v501_v19, %v277_v20 }
 0x125   : > { %v279_v22 = vmul.f32 0.5, %v278_v21 }
 0x127   : > { %v280_v23 = vsub.f32 1.5, %v279_v22 }
 0x129   : > { %v281_v24 = vmul.f32 %v501_v19, %v280_v23 }
 0x12b   : > { %v285_v26 = vsel %vm284_vm4, %v501_v19, %v281_v24 }
 0x12c   : > { %v288_v27 = vmul.f32 %v285_v26, %v269_v13 }
 0x12e   : > { %v292_v29 = vmul.f32 %v496_v25, %v288_v27 }
 0x130   : > { %v296_v30 = vadd.f32 %v497_v28, %v292_v29 }
 0x132   : > { %297 = vst.msk [vmem:[%s253_s18] sm:$0xff] %vm257_vm0, %v296_v30 }
 0x133   : > { %589 = shalt.err (!%p586_p0)
}
 0x134   : > { %428 = dma.vmem_to_hbm [thread:$0]  (%p756_p5), %s313_s29, 128, %s315_s5, %s299_s24  }
 0x135 PF: > { %s326_s8 = sand.u32 1, %s628_s15   ;;  %p439_p3 = pnand %p411_p9, %p726_p6 }
 0x136   : > { %s327_s9 = scalar_lea.sflag [#allocation4], %s326_s8 }
 0x137   : > { %p440_p7 = pneg %p439_p3 }
 0x139   : > { %623 = dma.done.wait (%p440_p7), %s327_s9, 128  }
 0x13a   : > { %625 = vsyncadd (%p440_p7), %s327_s9, 4294967168  ;;  %s21_s20 = sadd.s32 1, %s648_s20   ;;  %s851_s15 = smov %s632_s16 }
 0x13b   : > { %p18_p10 = scmp.ge.s32.totalorder %s21_s20, 4   ;;  %s852_s16 = smov %s636_s17 }
 0x13c   : > { %s853_s17 = smov %s765_s14  ;;  %s854_s18 = smov %s644_s19 }
 0x13d   : > { %s855_s19 = smov %s857_s7  ;;  %20 = sbr.rel (!%p18_p10) target bundleno = 7 (0x7), region = 86 }
 0x142   :  { %333 = vsyncpa [#allocation3], 1 }
 0x143   :  { %335 = vsyncpa [#allocation3 + $0x1], 1 }
 0x144   :  { %336 = vsyncpa [#allocation6], 1 }
 0x145   :  { %337 = vsyncpa [#allocation4], 1 }
 0x146   :  { %339 = vsyncpa [#allocation4 + $0x1], 1 }

</bundles_post_ra>
